<compile_context>
chip_gen: v7x
topology: tpu7x:2x2x1
jax: 0.10.0
libtpu: 0.0.40
codegen_flags: <defaults>
</compile_context>

<pallas_src>
import jax
import jax.numpy as jnp
from jax import lax
from jax.experimental import pallas as pl
from jax.experimental.pallas import tpu as pltpu


def _dialogue_head_kernel(lhs_ref, emo_ref, wfc_ref, bfc_ref, out_ref):
    # lhs_ref / emo_ref: [Bb, H] f32 -- only the last-timestep rows are ever
    # DMA'd (the rest of the [S, B, H] tensors never leaves HBM).
    feat = lhs_ref[...] + emo_ref[...]                         # VPU add, f32
    # fc: f32 operands, full-precision MXU path, f32 accumulation.  The kernel
    # is HBM-bound, so this costs no wall-clock vs bf16 and keeps numerics.
    acc = jnp.dot(feat, wfc_ref[...],
                  preferred_element_type=jnp.float32,
                  precision=lax.Precision.HIGHEST)             # [Bb, Tp]
    out_ref[...] = acc + bfc_ref[...]                          # lane-dense store


def prepare_fc_params(fc_weight, fc_bias):
    """One-time parameter prep: pad the target dim to a lane-dense multiple of
    128 (zero columns, sliced off after the kernel).  Doing this once avoids a
    per-call pad/copy XLA op that would rival the kernel itself in cost.

    fc_weight: [H, T] (stored pre-transposed, [in, out]);  fc_bias: [1, T].
    """
    H, T = fc_weight.shape
    Tp = max(128, pl.cdiv(T, 128) * 128)
    wfc_p = jnp.zeros((H, Tp), jnp.float32).at[:, :T].set(
        fc_weight.astype(jnp.float32))
    bfc_p = jnp.zeros((1, Tp), jnp.float32).at[:, :T].set(
        fc_bias.astype(jnp.float32))
    return wfc_p, bfc_p


def _vmem_budget_bytes():
    """Chip-aware sizing budget: half of physical VMEM, capped at 64 MiB.

    v7x: 64 MiB physical -> 32 MiB budget (matches the scoped default);
    v5e/v6e: 128 MiB physical -> 64 MiB budget.  Falls back to the most
    conservative (v7x) figure if the hardware query is unavailable.
    """
    phys = 64 * 1024 * 1024
    try:
        info = pltpu.get_tpu_info()
        phys = int(getattr(info, "vmem_capacity_bytes", phys))
    except Exception:
        pass
    return min(phys // 2, 64 * 1024 * 1024)


def _choose_bb(B, H, Tp, budget_bytes):
    """Batch rows per grid step, with full VMEM accounting.

    Per step (all f32):
      inputs : 2 arrays x 2 buffers x Bb x H
      output : 2 buffers x Bb x Tp
      weight : H x Tp (resident; counted x2 conservatively) + bias.
    A batch that fits runs as one step (no forced split -- no megacore benefit
    on single-TC v5e/v6e and each step costs ~0.35 us).  Otherwise prefer a
    sublane-aligned divisor of B (no masked tail block), ideally giving an
    even step count so v7x's two TensorCores split evenly.
    """
    itemsize = 4
    fixed = (2 * H * Tp + 2 * Tp) * itemsize
    per_row = (2 * 2 * H + 2 * Tp) * itemsize
    avail = max(budget_bytes - fixed, 8 * per_row)
    cap = max(8, ((avail // per_row) // 8) * 8)
    if B <= cap:
        return B                                   # single grid step
    best_odd = 0
    for bb in range(cap, 7, -8):                   # cap is already 8-aligned
        if B % bb == 0:
            if (B // bb) % 2 == 0:
                return bb                          # even step count
            if best_odd == 0:
                best_odd = bb
    if best_odd:
        return best_odd
    return cap                                     # masked tail block fallback


def dialogue_rnn_head(last_hidden_states, emotions, wfc_p, bfc_p, target_size):
    """DialogueRNNModel forward head.

    Args:
      last_hidden_states, emotions: [S, B, H] float32 (DialogueRNN outputs,
        seq-major, as in the torch module before the permute).
      wfc_p: [H, Tp] float32, padded fc weight from prepare_fc_params.
      bfc_p: [1, Tp] float32, padded fc bias from prepare_fc_params.
      target_size: T (unpadded output width).
    Returns:
      [B, T] float32.
    """
    S, B, H = last_hidden_states.shape
    Tp = wfc_p.shape[1]

    budget = _vmem_budget_bytes()
    Bb = _choose_bb(B, H, Tp, budget)
    grid = (pl.cdiv(B, Bb),)

    cost = pl.CostEstimate(
        flops=2 * B * H * Tp,
        transcendentals=0,
        bytes_accessed=(2 * B * H * 4          # last-timestep rows of both inputs
                        + H * Tp * 4           # fc weight (resident)
                        + Tp * 4               # bias
                        + B * Tp * 4))         # output

    out = pl.pallas_call(
        _dialogue_head_kernel,
        out_shape=jax.ShapeDtypeStruct((B, Tp), jnp.float32),
        grid_spec=pltpu.PrefetchScalarGridSpec(
            num_scalar_prefetch=0,
            grid=grid,
            in_specs=[
                # Only the last timestep (seq block index S-1) is ever fetched.
                pl.BlockSpec((None, Bb, H), lambda b: (S - 1, b, 0)),
                pl.BlockSpec((None, Bb, H), lambda b: (S - 1, b, 0)),
                pl.BlockSpec((H, Tp), lambda b: (0, 0)),    # fc weight (resident)
                pl.BlockSpec((1, Tp), lambda b: (0, 0)),    # fc bias (resident)
            ],
            out_specs=pl.BlockSpec((Bb, Tp), lambda b: (b, 0)),
        ),
        compiler_params=pltpu.CompilerParams(
            dimension_semantics=("parallel",),
            vmem_limit_bytes=budget),
        cost_estimate=cost,
    )(last_hidden_states, emotions, wfc_p, bfc_p)

    return out[:, :target_size]


def _reference(last_hidden_states, emotions, fc_weight, fc_bias):
    # feature(): permute to [B, S, H], take the last timestep of each, add.
    feature = last_hidden_states[-1] + emotions[-1]            # [B, H]
    # forward(): fc_dropout is identity at eval; Linear with pre-transposed W.
    return jnp.dot(feature, fc_weight,
                   precision=lax.Precision.HIGHEST) + fc_bias  # [B, T]


if __name__ == "__main__":
    # Small shapes consistent with the module's forward:
    S, B, H, T = 8, 2, 32, 4   # seq, batch, cfg.hidden_size, cfg.target_size

    key = jax.random.PRNGKey(0)
    k1, k2, k3, k4 = jax.random.split(key, 4)
    last_hidden_states = jax.random.normal(k1, (S, B, H), jnp.float32)
    emotions = jax.random.normal(k2, (S, B, H), jnp.float32)
    # _init_weights: Linear weight ~ N(0, 0.1), bias zeroed.  A small nonzero
    # bias is used here only to exercise the bias-add path.
    fc_weight = 0.1 * jax.random.normal(k3, (H, T), jnp.float32)
    fc_bias = 0.01 * jax.random.normal(k4, (1, T), jnp.float32)

    # One-time parameter prep (done at load time in a real deployment).
    wfc_p, bfc_p = prepare_fc_params(fc_weight, fc_bias)
    wfc_p, bfc_p = jax.block_until_ready((wfc_p, bfc_p))

    out = dialogue_rnn_head(last_hidden_states, emotions, wfc_p, bfc_p, T)
    out = jax.block_until_ready(out)

    ref = _reference(last_hidden_states, emotions, fc_weight, fc_bias)
    assert out.shape == (B, T)
    # f32 operands + f32 accumulation -> tight tolerance.
    assert jnp.allclose(out, ref, atol=1e-4, rtol=1e-4), (out, ref)
    print("KERNEL_OK")
</pallas_src>

<mosaic_0001>
module attributes {stable_mosaic.version = 11 : i64} {
  func.func @_dialogue_head_kernel(%arg0: i32, %arg1: memref<1x2x32xf32, #tpu.memory_space<vmem>>, %arg2: memref<1x2x32xf32, #tpu.memory_space<vmem>>, %arg3: memref<32x128xf32, #tpu.memory_space<vmem>>, %arg4: memref<1x128xf32, #tpu.memory_space<vmem>>, %arg5: memref<2x128xf32, #tpu.memory_space<vmem>>) attributes {dimension_semantics = [#tpu.dimension_semantics<parallel>], iteration_bounds = array<i64: 1>, scalar_prefetch = 0 : i64, scratch_operands = 0 : i64, tpu.core_type = #tpu.core_type<tc>, window_params = [{transform_indices = @transform_0, window_bounds = array<i64: 1, 2, 32>}, {transform_indices = @transform_1, window_bounds = array<i64: 1, 2, 32>}, {pipeline_mode = #tpu.pipeline_mode<synchronous>, transform_indices = @transform_2, window_bounds = array<i64: 32, 128>}, {pipeline_mode = #tpu.pipeline_mode<synchronous>, transform_indices = @transform_3, window_bounds = array<i64: 1, 128>}, {transform_indices = @transform_4, window_bounds = array<i64: 2, 128>}]} {
    %c0 = arith.constant 0 : index
    %c0_0 = arith.constant 0 : index
    %c0_1 = arith.constant 0 : index
    %0 = vector.load %arg1[%c0, %c0_0, %c0_1] : memref<1x2x32xf32, #tpu.memory_space<vmem>>, vector<1x2x32xf32>
    %1 = vector.shape_cast %0 : vector<1x2x32xf32> to vector<2x32xf32>
    %c0_2 = arith.constant 0 : index
    %c0_3 = arith.constant 0 : index
    %c0_4 = arith.constant 0 : index
    %2 = vector.load %arg2[%c0_2, %c0_3, %c0_4] : memref<1x2x32xf32, #tpu.memory_space<vmem>>, vector<1x2x32xf32>
    %3 = vector.shape_cast %2 : vector<1x2x32xf32> to vector<2x32xf32>
    %4 = arith.addf %1, %3 : vector<2x32xf32>
    %c0_5 = arith.constant 0 : index
    %c0_6 = arith.constant 0 : index
    %5 = vector.load %arg3[%c0_5, %c0_6] : memref<32x128xf32, #tpu.memory_space<vmem>>, vector<32x128xf32>
    %cst = arith.constant dense<0.000000e+00> : vector<2x128xf32>
    %6 = tpu.matmul %4, %5, %cst {dimension_numbers = #tpu.dot_dimension_numbers<[1], [0], [0], [1], [0, 0, 1, 1], [], []>, precision = #tpu.contract_precision<fp32>} : vector<2x32xf32>, vector<32x128xf32>, vector<2x128xf32> -> vector<2x128xf32>
    %c0_7 = arith.constant 0 : index
    %c0_8 = arith.constant 0 : index
    %7 = vector.load %arg4[%c0_7, %c0_8] : memref<1x128xf32, #tpu.memory_space<vmem>>, vector<1x128xf32>
    %8 = vector.broadcast %7 : vector<1x128xf32> to vector<2x128xf32>
    %9 = arith.addf %6, %8 : vector<2x128xf32>
    %c0_9 = arith.constant 0 : index
    %c0_10 = arith.constant 0 : index
    %10 = vector.load %arg5[%c0_9, %c0_10] : memref<2x128xf32, #tpu.memory_space<vmem>>, vector<2x128xf32>
    tpu.vector_store %arg5[%c0_9, %c0_10], %9 {strides = array<i32>} : memref<2x128xf32, #tpu.memory_space<vmem>>, vector<2x128xf32>,
    return
  }
  func.func @transform_0(%arg0: i32) -> (i32, i32, i32) {
    %c7_i32 = arith.constant 7 : i32
    %c0_i32 = arith.constant 0 : i32
    %c0_i32_0 = arith.constant 0 : i32
    return %c7_i32, %arg0, %c0_i32 : i32, i32, i32
  }
  func.func @transform_1(%arg0: i32) -> (i32, i32, i32) {
    %c7_i32 = arith.constant 7 : i32
    %c0_i32 = arith.constant 0 : i32
    %c0_i32_0 = arith.constant 0 : i32
    return %c7_i32, %arg0, %c0_i32 : i32, i32, i32
  }
  func.func @transform_2(%arg0: i32) -> (i32, i32) {
    %c0_i32 = arith.constant 0 : i32
    %c0_i32_0 = arith.constant 0 : i32
    %c0_i32_1 = arith.constant 0 : i32
    return %c0_i32, %c0_i32_0 : i32, i32
  }
  func.func @transform_3(%arg0: i32) -> (i32, i32) {
    %c0_i32 = arith.constant 0 : i32
    %c0_i32_0 = arith.constant 0 : i32
    %c0_i32_1 = arith.constant 0 : i32
    return %c0_i32, %c0_i32_0 : i32, i32
  }
  func.func @transform_4(%arg0: i32) -> (i32, i32) {
    %c0_i32 = arith.constant 0 : i32
    %c0_i32_0 = arith.constant 0 : i32
    return %arg0, %c0_i32 : i32, i32
  }
}

</mosaic_0001>

<bundles_post_ra>
// kernel: tpu_custom_call.1
= control target key start
LH: loop header
LB: loop body
LE: loop exit
PB: predicated region body
PF: predicated region fallthrough
CT: control target
= control target key end

     0   :  { %9 = vsyncpa [#allocation3], 0  ;;  %s938_s0 = inlined_call_operand.hbm [shape: f32[8,2,32], index: 0, kind: input, shape index: {}]   ;;  %s939_s1 = inlined_call_operand.hbm [shape: f32[8,2,32], index: 1, kind: input, shape index: {}]   ;;  %s940_s2 = inlined_call_operand.hbm [shape: f32[32,128], index: 2, kind: input, shape index: {}]   ;;  %s941_s3 = inlined_call_operand.vmem [shape: f32[1,128], index: 3, kind: input, shape index: {}]   ;;  %s942_s4 = inlined_call_operand.hbm [shape: f32[2,128], index: 4, kind: output, shape index: {}]  }
   0x1   :  { %10 = vsyncpa [#allocation6], 0  ;;  %s28_s17 = scalar_lea.hbm %s939_s1, 224 }
   0x2   :  { %11 = vsyncpa [#allocation4], 0  ;;  %s829_s18 = smov [#allocation5]   ;;  %s869_s22 = scalar_lea.hbm %s938_s0, 224 }
   0x3   :  { %s30_s19 = sshll.u32 %s829_s18, 4  ;;  %s753_s25 = scalar_lea.hbm %s939_s1, 256  ;;  %s31_s19 = int_to_ptr.vmem [resolvable:$true] %s30_s19 }
   0x4   :  { %p730_p0 = scmp.ne.s32.totalorder %s28_s17, %s753_s25  ;;  %p732_p1 = scmp.lt.u32.totalorder %s28_s17, %s939_s1 }
   0x5   :  { %p733_p2 = scmp.lt.u32.totalorder %s753_s25, %s753_s25  ;;  %p735_p4 = scmp.lt.u32.totalorder %s753_s25, %s28_s17 }
   0x7   :  { %p734_p3 = por %p733_p2, %p732_p1 }
   0x9   :  { %p736_p5 = por %p735_p4, %p734_p3 }
   0xb   :  { %p737_p6 = pnand %p736_p5, %p730_p0 }
   0xd   :  { %740 = shalt.err (!%p737_p6)
}
   0xe   :  { %s741_s28 = scalar_lea.vmem %s31_s19, 32  ;;  %p746_p8 = scmp.lt.s32.totalorder %s31_s19, %s31_s19 }
   0xf   :  { %p742_p7 = scmp.ne.s32.totalorder %s31_s19, %s741_s28  ;;  %p747_p9 = scmp.lt.s32.totalorder %s741_s28, %s741_s28 }
  0x11   :  { %p748_p10 = por %p747_p9, %p746_p8 }
  0x13   :  { %p749_p11 = pnand %p748_p10, %p742_p7 }
  0x15   :  { %752 = shalt.err (!%p749_p11)
}
  0x16   :  { %33 = dma.hbm_to_vmem [thread:$0]  %s28_s17, 32, %s31_s19, [#allocation6]  }
  0x17   :  { %s830_s29 = smov [#allocation2]   ;;  %s831_s1 = smov [#allocation7]  }
  0x18   :  { %s19_s30 = sshll.u32 %s830_s29, 4  ;;  %s39_s5 = sshll.u32 %s831_s1, 4  ;;  %s20_s30 = int_to_ptr.vmem [resolvable:$true] %s19_s30  ;;  %s40_s5 = int_to_ptr.vmem [resolvable:$true] %s39_s5 }
  0x19   :  { %s778_s8 = scalar_lea.hbm %s938_s0, 256  ;;  %p757_p13 = scmp.lt.u32.totalorder %s869_s22, %s938_s0 }
  0x1a   :  { %p755_p12 = scmp.ne.s32.totalorder %s869_s22, %s778_s8  ;;  %p758_p0 = scmp.lt.u32.totalorder %s778_s8, %s778_s8 }
  0x1b   :  { %p760_p2 = scmp.lt.u32.totalorder %s778_s8, %s869_s22 }
  0x1c   :  { %p759_p1 = por %p758_p0, %p757_p13 }
  0x1e   :  { %p761_p3 = por %p760_p2, %p759_p1 }
  0x20   :  { %p762_p4 = pnand %p761_p3, %p755_p12 }
  0x22   :  { %765 = shalt.err (!%p762_p4)
}
  0x23   :  { %s766_s11 = scalar_lea.vmem %s20_s30, 32  ;;  %p771_p6 = scmp.lt.s32.totalorder %s20_s30, %s20_s30 }
  0x24   :  { %p767_p5 = scmp.ne.s32.totalorder %s20_s30, %s766_s11  ;;  %p772_p7 = scmp.lt.s32.totalorder %s766_s11, %s766_s11 }
  0x26   :  { %p773_p8 = por %p772_p7, %p771_p6 }
  0x28   :  { %p774_p9 = pnand %p773_p8, %p767_p5 }
  0x2a   :  { %777 = shalt.err (!%p774_p9)
}
  0x2b   :  { %22 = dma.hbm_to_vmem [thread:$0]  %s869_s22, 32, %s20_s30, [#allocation3]  }
  0x2c   :  { %s779_s0 = scalar_lea.hbm %s940_s2, 512 }
  0x2d   :  { %p780_p10 = scmp.ne.s32.totalorder %s940_s2, %s779_s0  ;;  %p783_p11 = scmp.lt.u32.totalorder %s779_s0, %s940_s2 }
  0x2f   :  { %p785_p12 = pnand %p783_p11, %p780_p10 }
  0x31   :  { %788 = shalt.err (!%p785_p12)
}
  0x32   :  { %s789_s18 = scalar_lea.vmem %s40_s5, 512  ;;  %p794_p0 = scmp.lt.s32.totalorder %s40_s5, %s40_s5 }
  0x33   :  { %p790_p13 = scmp.ne.s32.totalorder %s40_s5, %s789_s18  ;;  %p795_p1 = scmp.lt.s32.totalorder %s789_s18, %s789_s18 }
  0x35   :  { %p796_p2 = por %p795_p1, %p794_p0 }
  0x37   :  { %p797_p3 = pnand %p796_p2, %p790_p13 }
  0x39   :  { %800 = shalt.err (!%p797_p3)
}
  0x3a   :  { %s832_s19 = smov 128   ;;  %s833_s20 = smov 8  }
  0x3b   :  { %45 = dma.hbm_to_vmem [thread:$0]  %s940_s2, 512, %s40_s5, [#allocation6], %s832_s19, %s832_s19, %s833_s20  }
  0x3c   :  { %823 = dma.done.wait [#allocation3], 32  }
  0x3d   :  { %824 = vsyncadd [#allocation3], 4294967264 }
  0x3e   :  { %825 = dma.done.wait [#allocation6], 544  }
  0x3f   :  { %826 = vsyncadd [#allocation6], 4294966752  ;;  %v834_v0 = vmov 0.0|0.0   ;;  %vm835_vm0 = vmmov 0   ;;  %v836_v1 = vmov 0.0   ;;  %v60_v2 = vld [vmem:[#allocation7] sm:$0xff] }
  0x40   :  { %692 = vmatprep.subr.bf16.mxu0 %v834_v0  ;;  %674 = vmatprep.subr.bf16.mxu1 %v834_v0  ;;  %v61_v3 = vld [vmem:[#allocation7 + $0x8] sm:$0xff]  ;;  %v62_v4 = vld [vmem:[#allocation7 + $0x10] sm:$0xff]  ;;  %v76_v5 = vand.u32 4294901760, %v60_v2  ;;  %v63_v7 = vld [vmem:[#allocation7 + $0x18] sm:$0xff]  ;;  %vm71_vm1 = vcmask 261120   ;;  %s837_s24 = smov [#allocation8]  }
  0x41   :  { %649 = vmatprep.mubr.msk.f32.mxu0 %vm835_vm0, %v836_v1  ;;  %616 = vmatprep.mubr.msk.f32.mxu1 %vm835_vm0, %v836_v1  ;;  %v79_v6 = vand.u32 4294901760, %v61_v3  ;;  %v82_v8 = vand.u32 4294901760, %v62_v4  ;;  %v57_v9 = vld [vmem:[#allocation2] sm:$0x3]  ;;  %v85_v10 = vand.u32 4294901760, %v63_v7  ;;  %s567_s25 = sshll.u32 %s837_s24, 4  ;;  %s568_s25 = int_to_ptr.vmem [resolvable:$true] %s567_s25 }
  0x42   :  { %v58_v11 = vld [vmem:[#allocation5] sm:$0x3]  ;;  %v156_v13 = vsub.f32 %v60_v2, %v76_v5  ;;  %v577_v45 = vld [vmem:[%s941_s3] ss:$0 sm:$0xff]  ;;  %s801_s26 = scalar_lea.vmem %s568_s25, 32  ;;  %p806_p5 = scmp.lt.s32.totalorder %s568_s25, %s568_s25 }
  0x43   :  { %v675_v12 = vpack.c.bf16 %v79_v6, %v76_v5  ;;  %v163_v14 = vsub.f32 %v61_v3, %v79_v6  ;;  %v170_v15 = vsub.f32 %v62_v4, %v82_v8  ;;  %v177_v16 = vsub.f32 %v63_v7, %v85_v10  ;;  %p802_p4 = scmp.ne.s32.totalorder %s568_s25, %s801_s26  ;;  %p807_p6 = scmp.lt.s32.totalorder %s801_s26, %s801_s26 }
  0x44   :  { %v59_v17 = vadd.f32 %v58_v11, %v57_v9  ;;  %v678_v18 = vpack.c.bf16 %v85_v10, %v82_v8  ;;  %v157_v19 = vand.u32 4294901760, %v156_v13 }
  0x45   :  { %694 = vmatpush3.bf16.msra.mxu0 %v675_v12  ;;  %676 = vmatpush3.bf16.msra.mxu1 %v675_v12  ;;  %v164_v20 = vand.u32 4294901760, %v163_v14  ;;  %v171_v22 = vand.u32 4294901760, %v170_v15  ;;  %v178_v23 = vand.u32 4294901760, %v177_v16  ;;  %v687_v41 = vpack.c.bf16 %v163_v14, %v156_v13  ;;  %p808_p7 = por %p807_p6, %p806_p5 }
  0x46   :  { %695 = vmatprep.subr.bf16.mxu0 %v834_v0  ;;  %677 = vmatprep.subr.bf16.mxu1 %v834_v0  ;;  %v73_v21 = vsel %vm71_vm1, %v59_v17, 0  ;;  %v158_v25 = vsub.f32 %v156_v13, %v157_v19  ;;  %v690_v42 = vpack.c.bf16 %v177_v16, %v170_v15 }
  0x47   :  { %v144_v24 = vand.u32 4294901760, %v73_v21  ;;  %v165_v26 = vsub.f32 %v163_v14, %v164_v20  ;;  %v699_v28 = vpack.c.bf16 %v164_v20, %v157_v19  ;;  %v172_v31 = vsub.f32 %v170_v15, %v171_v22  ;;  %p809_p8 = pnand %p808_p7, %p802_p4 }
  0x48   :  { %v159_v29 = vand.u32 4294901760, %v158_v25  ;;  %v179_v32 = vsub.f32 %v177_v16, %v178_v23  ;;  %v702_v36 = vpack.c.bf16 %v178_v23, %v171_v22 }
  0x49   :  { %697 = vmatpush3.bf16.msra.mxu0 %v678_v18  ;;  %679 = vmatpush3.bf16.msra.mxu1 %v678_v18  ;;  %v145_v27 = vsub.f32 %v73_v21, %v144_v24  ;;  %v166_v30 = vand.u32 4294901760, %v165_v26  ;;  %v173_v37 = vand.u32 4294901760, %v172_v31 }
  0x4a   :  { %698 = vmatprep.subr.bf16.mxu0 %v834_v0  ;;  %680 = vmatprep.subr.bf16.mxu1 %v834_v0  ;;  %v180_v38 = vand.u32 4294901760, %v179_v32 }
  0x4b   :  { %v146_v33 = vand.u32 4294901760, %v145_v27  ;;  %v681_v35 = vpack.c.bf16 %v166_v30, %v159_v29 }
  0x4c   :  { %v684_v40 = vpack.c.bf16 %v180_v38, %v173_v37 }
  0x4d   :  { %650 = vmatmul.mubr.f32.vlgmr.msra.gmra.mrb[0].mxu0 %v146_v33  ;;  %v147_v34 = vsub.f32 %v145_v27, %v146_v33 }
  0x4e   :  { %700 = vmatpush3.bf16.msra.mxu0 %v699_v28  ;;  %660 = vmatprep.mubr.msk.f32.mxu0 %vm835_vm0, %v836_v1 }
  0x4f   :  { %v148_v39 = vand.u32 4294901760, %v147_v34  ;;  %701 = vmatprep.subr.bf16.mxu0 %v834_v0 }
  0x51   :  { %617 = vmatmul.mubr.f32.vlgmr.msra.gmra.mrb[0].mxu1 %v148_v39 }
  0x52   :  { %682 = vmatpush3.bf16.msra.mxu1 %v681_v35  ;;  %703 = vmatpush3.bf16.msra.mxu0 %v702_v36 }
  0x53   :  { %683 = vmatprep.subr.bf16.mxu1 %v834_v0  ;;  %704 = vmatprep.subr.bf16.mxu0 %v834_v0 }
  0x54   :  { %627 = vmatprep.mubr.msk.f32.mxu1 %vm835_vm0, %v836_v1 }
  0x55   :  { %661 = vmatmul.mubr.f32.vlgmr.msra.gmra.mrb[0].mxu0 %v144_v24 }
  0x56   :  { %685 = vmatpush3.bf16.msra.mxu1 %v684_v40  ;;  %706 = vmatpush3.bf16.msra.mxu0 %v675_v12 }
  0x57   :  { %686 = vmatprep.subr.bf16.mxu1 %v834_v0  ;;  %707 = vmatprep.subr.bf16.mxu0 %v834_v0 }
  0x58   :  { %671 = vmatprep.mubr.msk.f32.mxu0 %vm835_vm0, %v836_v1 }
  0x59   :  { %628 = vmatmul.mubr.f32.vlgmr.msra.gmra.mrb[0].mxu1 %v144_v24 }
  0x5a   :  { %688 = vmatpush3.bf16.msra.mxu1 %v687_v41  ;;  %709 = vmatpush3.bf16.msra.mxu0 %v678_v18 }
  0x5b   :  { %689 = vmatprep.subr.bf16.mxu1 %v834_v0  ;;  %638 = vmatprep.mubr.msk.f32.mxu1 %vm835_vm0, %v836_v1 }
  0x5d   :  { %672 = vmatmul.mubr.f32.vlgmr.msra.gmra.mrb[0].mxu0 %v144_v24 }
  0x5e   :  { %691 = vmatpush3.bf16.msra.mxu1 %v690_v42 }
  0x61   :  { %639 = vmatmul.mubr.f32.vlgmr.msra.gmra.mrb[0].mxu1 %v145_v27 }
 0x130   :  { %v556_v43 = vpop.f32.mrb[0].mxu0 }
 0x131   :  { %v673_v44 = vpop.f32.mrb[1].mxu0 }
 0x134   :  { %v321_v46 = vpop.f32.mrb[0].mxu1 }
 0x135   :  { %v710_v47 = vadd.f32 %v577_v45, %v321_v46  ;;  %v640_v48 = vpop.f32.mrb[1].mxu1 }
 0x137   :  { %v711_v49 = vadd.f32 %v710_v47, %v556_v43 }
 0x139   :  { %560 = vst [vmem:[#allocation8] sm:$0x3] %v711_v49 }
 0x13a   :  { %812 = shalt.err (!%p809_p8)
}
 0x13b   :  { %s813_s29 = scalar_lea.hbm %s942_s4, 32 }
 0x13c   :  { %p814_p9 = scmp.ne.s32.totalorder %s942_s4, %s813_s29  ;;  %p817_p10 = scmp.lt.u32.totalorder %s813_s29, %s942_s4 }
 0x13e   :  { %p819_p11 = pnand %p817_p10, %p814_p9 }
 0x140   :  { %822 = shalt.err (!%p819_p11)
}
 0x141   :  { %570 = dma.vmem_to_hbm [thread:$0]  %s568_s25, 32, %s942_s4, [#allocation4]  }
 0x142   :  { %827 = dma.done.wait [#allocation4], 32  }
 0x143   :  { %828 = vsyncadd [#allocation4], 4294967264 }
 0x144   :  { %574 = vsyncpa [#allocation3], 1 }
 0x145   :  { %575 = vsyncpa [#allocation6], 1 }
 0x146   :  { %576 = vsyncpa [#allocation4], 1 }

</bundles_post_ra>
